<compile_context>
chip_gen: v7x
topology: tpu7x:2x2x1
jax: 0.10.0
libtpu: 0.0.40
codegen_flags: <defaults>
</compile_context>

<pallas_src>
import jax
import jax.numpy as jnp
from jax.experimental import pallas as pl
from jax.experimental.pallas import tpu as pltpu

# ---- model config (small, synthetic) ---------------------------------------
PIXEL_MEAN = 127.5   # registered buffer: torch.tensor(pixel_mean).view(-1,1,1)
PIXEL_STD = 64.0     # registered buffer: torch.tensor(pixel_std).view(-1,1,1)

C_IN = 4             # input image channels
C_FEAT = 32          # backbone feature channels
NUM_CLASSES = 8      # sem_seg_head output classes

MAX_TILE_PIX = 8192  # upper bound on pixels per grid step (lane-axis tile)


def _choose_tile_pix(hw):
    """Largest multiple of 128 that divides H*W, capped at MAX_TILE_PIX."""
    assert hw % 128 == 0, "H*W must be a multiple of 128 (lane width)"
    tile = min(MAX_TILE_PIX, hw)
    while hw % tile != 0 or tile % 128 != 0:
        tile -= 128
    return tile


def _segmentor_kernel(x_ref, w1_ref, b1_ref, w2_ref, b2_ref, o_ref):
    """Fused backbone 1x1 conv + ReLU + head 1x1 conv; pixels on the lane axis.

    Pixel normalization ((x - mean) / std) is pre-folded into w1/b1.

    x_ref : (C_IN, TILE_PIX)        f32 pixels for this (batch, tile) step
    w1_ref: (C_FEAT, C_IN)          bf16 backbone weights (normalize folded in)
    b1_ref: (C_FEAT, 1)             f32 backbone bias (normalize folded in)
    w2_ref: (NUM_CLASSES, C_FEAT)   bf16 head weights
    b2_ref: (NUM_CLASSES, 1)        f32 head bias
    o_ref : (NUM_CLASSES, TILE_PIX) class logits (lane-dense output)
    """
    x = x_ref[...].astype(jnp.bfloat16)

    # backbone: 1x1 conv == matmul over the channel axis, then ReLU.
    feat = jnp.dot(w1_ref[...], x, preferred_element_type=jnp.float32)
    feat = jnp.maximum(feat + b1_ref[...], 0.0)

    # sem_seg_head: 1x1 conv to class logits.
    logits = jnp.dot(w2_ref[...], feat.astype(jnp.bfloat16),
                     preferred_element_type=jnp.float32)
    o_ref[...] = (logits + b2_ref[...]).astype(o_ref.dtype)


def semantic_segmentor_forward(images_nchw, params, img_sizes,
                               out_dtype=jnp.bfloat16):
    """Inference forward pass of SemanticSegmentor.

    images_nchw: (B, C_IN, H, W) float32   (PyTorch NCHW convention)
    params     : dict with w1t (C_FEAT,C_IN) bf16, b1 (C_FEAT,1) f32,
                 w2t (NUM_CLASSES,C_FEAT) bf16, b2 (NUM_CLASSES,1) f32
                 (normalization already folded into w1t/b1 at init time)
    img_sizes  : list of (h, w) per sample (static)

    Returns list of per-sample pred_sem_seg tensors of shape
    (NUM_CLASSES, h, w) — i.e. result[:, :h, :w].
    """
    B, C, H, W = images_nchw.shape
    assert C == C_IN
    HW = H * W
    tile = _choose_tile_pix(HW)

    # NCHW-native: a pure reshape, no transpose / extra HBM round trip.
    x = images_nchw.reshape(B, C_IN, HW)

    grid = (B, HW // tile)

    flops = 2 * B * HW * (C_IN * C_FEAT + C_FEAT * NUM_CLASSES)
    bytes_accessed = (
        B * HW * C_IN * 4                               # f32 input read
        + B * HW * NUM_CLASSES * jnp.dtype(out_dtype).itemsize  # logits write
        + params["w1t"].size * 2 + params["w2t"].size * 2
        + params["b1"].size * 4 + params["b2"].size * 4)

    logits = pl.pallas_call(
        _segmentor_kernel,
        out_shape=jax.ShapeDtypeStruct((B, NUM_CLASSES, HW), out_dtype),
        grid_spec=pltpu.PrefetchScalarGridSpec(
            num_scalar_prefetch=0,
            grid=grid,
            in_specs=[
                # pixels: batch dim squeezed, channels on sublanes, pixels on lanes
                pl.BlockSpec((None, C_IN, tile), lambda b, p: (b, 0, p)),
                pl.BlockSpec((C_FEAT, C_IN), lambda b, p: (0, 0)),         # w1t
                pl.BlockSpec((C_FEAT, 1), lambda b, p: (0, 0)),            # b1
                pl.BlockSpec((NUM_CLASSES, C_FEAT), lambda b, p: (0, 0)),  # w2t
                pl.BlockSpec((NUM_CLASSES, 1), lambda b, p: (0, 0)),       # b2
            ],
            out_specs=pl.BlockSpec((None, NUM_CLASSES, tile),
                                   lambda b, p: (b, 0, p)),
        ),
        compiler_params=pltpu.CompilerParams(
            dimension_semantics=("parallel", "parallel")),
        cost_estimate=pl.CostEstimate(
            flops=flops, transcendentals=0, bytes_accessed=bytes_accessed),
    )(x, params["w1t"], params["b1"], params["w2t"], params["b2"])

    # (B, K, H*W) -> (B, K, H, W): pure reshape, already NCHW.
    results = logits.reshape(B, NUM_CLASSES, H, W)

    # "for result, sample in zip(results, samples): pred_sem_seg = result[:, :h, :w]"
    preds = []
    for b, (h, w) in enumerate(img_sizes):
        preds.append(results[b, :, :h, :w])
    # TODO(synk): training path (sem_seg_head loss computation) not implemented;
    # only the inference/eval path is reproduced here.
    return preds


def init_params(key, pixel_mean=PIXEL_MEAN, pixel_std=PIXEL_STD):
    k1, k2, k3, k4 = jax.random.split(key, 4)
    # Output-channel-major ("transposed") layout so channels land on sublanes
    # and pixels on lanes inside the kernel.
    w1t = jax.random.normal(k1, (C_FEAT, C_IN), jnp.float32) * 0.1
    b1 = jax.random.normal(k2, (C_FEAT, 1), jnp.float32) * 0.01
    w2t = jax.random.normal(k3, (NUM_CLASSES, C_FEAT), jnp.float32) * 0.1
    b2 = jax.random.normal(k4, (NUM_CLASSES, 1), jnp.float32) * 0.01

    # Fold the pixel normalization into the backbone's 1x1 conv, once at
    # param-init time (done per input channel so per-channel stats also work):
    #   W1t @ ((x - mean)/std) + b1 == (W1t/std) @ x + (b1 - (W1t/std) @ mean)
    mean = jnp.broadcast_to(jnp.asarray(pixel_mean, jnp.float32), (C_IN,))
    std = jnp.broadcast_to(jnp.asarray(pixel_std, jnp.float32), (C_IN,))
    w1_fold = w1t / std[None, :]
    b1_fold = b1 - w1_fold @ mean[:, None]

    return {
        "w1t": w1_fold.astype(jnp.bfloat16),
        "b1": b1_fold,
        "w2t": w2t.astype(jnp.bfloat16),
        "b2": b2,
    }


if __name__ == "__main__":
    key = jax.random.PRNGKey(0)
    kp, kx = jax.random.split(key)
    params = init_params(kp)

    B, H, W = 2, 16, 16
    # Synthetic "SegImageSample" images, NCHW, uint8-like pixel range.
    images = jax.random.uniform(kx, (B, C_IN, H, W), jnp.float32,
                                minval=0.0, maxval=255.0)
    img_sizes = [(16, 16), (12, 10)]   # per-sample (h, w) for the final crop

    preds = semantic_segmentor_forward(images, params, img_sizes)
    preds = [jax.block_until_ready(p) for p in preds]

    assert preds[0].shape == (NUM_CLASSES, 16, 16)
    assert preds[1].shape == (NUM_CLASSES, 12, 10)
    assert all(bool(jnp.all(jnp.isfinite(p.astype(jnp.float32)))) for p in preds)
    print("KERNEL_OK")
</pallas_src>

<mosaic_0001>
module attributes {stable_mosaic.version = 11 : i64} {
  func.func @_segmentor_kernel(%arg0: i32, %arg1: i32, %arg2: memref<1x4x256xf32, #tpu.memory_space<vmem>>, %arg3: memref<32x4xbf16, #tpu.memory_space<vmem>>, %arg4: memref<32x1xf32, #tpu.memory_space<vmem>>, %arg5: memref<8x32xbf16, #tpu.memory_space<vmem>>, %arg6: memref<8x1xf32, #tpu.memory_space<vmem>>, %arg7: memref<1x8x256xbf16, #tpu.memory_space<vmem>>) attributes {dimension_semantics = [#tpu.dimension_semantics<parallel>, #tpu.dimension_semantics<parallel>], iteration_bounds = array<i64: 2, 1>, scalar_prefetch = 0 : i64, scratch_operands = 0 : i64, tpu.core_type = #tpu.core_type<tc>, window_params = [{transform_indices = @transform_0, window_bounds = array<i64: 1, 4, 256>}, {pipeline_mode = #tpu.pipeline_mode<synchronous>, transform_indices = @transform_1, window_bounds = array<i64: 32, 4>}, {pipeline_mode = #tpu.pipeline_mode<synchronous>, transform_indices = @transform_2, window_bounds = array<i64: 32, 1>}, {pipeline_mode = #tpu.pipeline_mode<synchronous>, transform_indices = @transform_3, window_bounds = array<i64: 8, 32>}, {pipeline_mode = #tpu.pipeline_mode<synchronous>, transform_indices = @transform_4, window_bounds = array<i64: 8, 1>}, {transform_indices = @transform_5, window_bounds = array<i64: 1, 8, 256>}]} {
    %c0 = arith.constant 0 : index
    %c0_0 = arith.constant 0 : index
    %c0_1 = arith.constant 0 : index
    %0 = vector.load %arg2[%c0, %c0_0, %c0_1] : memref<1x4x256xf32, #tpu.memory_space<vmem>>, vector<1x4x256xf32>
    %1 = vector.shape_cast %0 : vector<1x4x256xf32> to vector<4x256xf32>
    %2 = arith.truncf %1 : vector<4x256xf32> to vector<4x256xbf16>
    %c0_2 = arith.constant 0 : index
    %c0_3 = arith.constant 0 : index
    %3 = vector.load %arg3[%c0_2, %c0_3] : memref<32x4xbf16, #tpu.memory_space<vmem>>, vector<32x4xbf16>
    %cst = arith.constant dense<0.000000e+00> : vector<32x256xf32>
    %4 = tpu.matmul %3, %2, %cst {dimension_numbers = #tpu.dot_dimension_numbers<[1], [0], [0], [1], [0, 0, 1, 1], [], []>} : vector<32x4xbf16>, vector<4x256xbf16>, vector<32x256xf32> -> vector<32x256xf32>
    %c0_4 = arith.constant 0 : index
    %c0_5 = arith.constant 0 : index
    %5 = vector.load %arg4[%c0_4, %c0_5] : memref<32x1xf32, #tpu.memory_space<vmem>>, vector<32x1xf32>
    %6 = vector.broadcast %5 : vector<32x1xf32> to vector<32x256xf32>
    %7 = arith.addf %4, %6 : vector<32x256xf32>
    %cst_6 = arith.constant 0.000000e+00 : f32
    %8 = vector.broadcast %cst_6 : f32 to vector<32x256xf32>
    %9 = arith.maximumf %7, %8 : vector<32x256xf32>
    %c0_7 = arith.constant 0 : index
    %c0_8 = arith.constant 0 : index
    %10 = vector.load %arg5[%c0_7, %c0_8] : memref<8x32xbf16, #tpu.memory_space<vmem>>, vector<8x32xbf16>
    %11 = arith.truncf %9 : vector<32x256xf32> to vector<32x256xbf16>
    %cst_9 = arith.constant dense<0.000000e+00> : vector<8x256xf32>
    %12 = tpu.matmul %10, %11, %cst_9 {dimension_numbers = #tpu.dot_dimension_numbers<[1], [0], [0], [1], [0, 0, 1, 1], [], []>} : vector<8x32xbf16>, vector<32x256xbf16>, vector<8x256xf32> -> vector<8x256xf32>
    %c0_10 = arith.constant 0 : index
    %c0_11 = arith.constant 0 : index
    %13 = vector.load %arg6[%c0_10, %c0_11] : memref<8x1xf32, #tpu.memory_space<vmem>>, vector<8x1xf32>
    %14 = vector.broadcast %13 : vector<8x1xf32> to vector<8x256xf32>
    %15 = arith.addf %12, %14 : vector<8x256xf32>
    %16 = arith.truncf %15 : vector<8x256xf32> to vector<8x256xbf16>
    %c0_12 = arith.constant 0 : index
    %c0_13 = arith.constant 0 : index
    %c0_14 = arith.constant 0 : index
    %17 = vector.load %arg7[%c0_12, %c0_13, %c0_14] : memref<1x8x256xbf16, #tpu.memory_space<vmem>>, vector<1x8x256xbf16>
    %18 = vector.shape_cast %17 : vector<1x8x256xbf16> to vector<8x256xbf16>
    %19 = vector.shape_cast %16 : vector<8x256xbf16> to vector<1x8x256xbf16>
    tpu.vector_store %arg7[%c0_12, %c0_13, %c0_14], %19 {strides = array<i32>} : memref<1x8x256xbf16, #tpu.memory_space<vmem>>, vector<1x8x256xbf16>,
    return
  }
  func.func @transform_0(%arg0: i32, %arg1: i32) -> (i32, i32, i32) {
    %c0_i32 = arith.constant 0 : i32
    %c0_i32_0 = arith.constant 0 : i32
    return %arg0, %c0_i32, %arg1 : i32, i32, i32
  }
  func.func @transform_1(%arg0: i32, %arg1: i32) -> (i32, i32) {
    %c0_i32 = arith.constant 0 : i32
    %c0_i32_0 = arith.constant 0 : i32
    %c0_i32_1 = arith.constant 0 : i32
    return %c0_i32, %c0_i32_0 : i32, i32
  }
  func.func @transform_2(%arg0: i32, %arg1: i32) -> (i32, i32) {
    %c0_i32 = arith.constant 0 : i32
    %c0_i32_0 = arith.constant 0 : i32
    %c0_i32_1 = arith.constant 0 : i32
    return %c0_i32, %c0_i32_0 : i32, i32
  }
  func.func @transform_3(%arg0: i32, %arg1: i32) -> (i32, i32) {
    %c0_i32 = arith.constant 0 : i32
    %c0_i32_0 = arith.constant 0 : i32
    %c0_i32_1 = arith.constant 0 : i32
    return %c0_i32, %c0_i32_0 : i32, i32
  }
  func.func @transform_4(%arg0: i32, %arg1: i32) -> (i32, i32) {
    %c0_i32 = arith.constant 0 : i32
    %c0_i32_0 = arith.constant 0 : i32
    %c0_i32_1 = arith.constant 0 : i32
    return %c0_i32, %c0_i32_0 : i32, i32
  }
  func.func @transform_5(%arg0: i32, %arg1: i32) -> (i32, i32, i32) {
    %c0_i32 = arith.constant 0 : i32
    %c0_i32_0 = arith.constant 0 : i32
    return %arg0, %c0_i32, %arg1 : i32, i32, i32
  }
}

</mosaic_0001>

<bundles_post_ra>
// kernel: tpu_custom_call.1
= control target key start
LH: loop header
LB: loop body
LE: loop exit
PB: predicated region body
PF: predicated region fallthrough
CT: control target
= control target key end

     0   :  { %10 = vsyncpa [#allocation3], 0  ;;  %s864_s0 = inlined_call_operand.vmem [shape: f32[2,4,256], index: 0, kind: input, shape index: {}]   ;;  %s865_s1 = inlined_call_operand.vmem [shape: bf16[32,4], index: 1, kind: input, shape index: {}]   ;;  %s866_s2 = inlined_call_operand.vmem [shape: f32[32,1], index: 2, kind: input, shape index: {}]   ;;  %s867_s3 = inlined_call_operand.vmem [shape: bf16[8,32], index: 3, kind: input, shape index: {}]   ;;  %s868_s4 = inlined_call_operand.vmem [shape: f32[8,1], index: 4, kind: input, shape index: {}]   ;;  %s869_s5 = inlined_call_operand.hbm [shape: bf16[2,8,256], index: 5, kind: output, shape index: {}]  }
   0x1   :  { %12 = vsyncpa [#allocation3 + $0x1], 0  ;;  %s728_s18 = smov 0   ;;  %s730_s19 = smov 0  }
   0x2   :  { %s732_s20 = smov 0   ;;  %s734_s21 = smov 0  }
   0x3   :  { %s736_s22 = smov 0   ;;  %s738_s23 = smov 0  }
   0x4 LB: > { %s532_s24 = sadd.s32 4294967295, %s694_s23   ;;  %s533_s25 = sadd.s32 4294967294, %s694_s23   ;;  %s694_s23 = sphi %s738_s23, %s18_s23   ;;  %s690_s22 = sphi %s736_s22, %s876_s22   ;;  %s686_s21 = sphi %s734_s21, %s875_s21   ;;  %s682_s20 = sphi %s732_s20, %s874_s20   ;;  %s678_s19 = sphi %s730_s19, %s873_s19   ;;  %s674_s18 = sphi %s728_s18, %s872_s18  }
   0x5   : > { %s30_s26 = sadd.s32 1, %s690_s22  ;;  %s151_s27 = sadd.s32 1, %s682_s20 }
   0x6   : > { %p32_p0 = scmp.ge.s32.totalorder %s30_s26, 2  ;;  %p161_p1 = scmp.ne.s32.totalorder %s682_s20, %s678_s19 }
   0x7   : > { %p162_p2 = scmp.eq.s32.totalorder %s532_s24, 1  ;;  %p167_p3 = scmp.ne.s32.totalorder %s678_s19, %s674_s18 }
   0x8   : > { %s878_s26 = smov (%p32_p0, %s30_s26), 0  ;;  %p168_p5 = scmp.eq.s32.totalorder %s533_s25, 1 }
   0x9   : > { %p768_p4 = por %p162_p2, %p161_p1  ;;  %s146_s29 = ssub.s32 %s690_s22, %s878_s26 }
   0xa   : > { %p536_p6 = scmp.ge.s32.totalorder %s694_s23, 1  ;;  %p149_p7 = scmp.eq.s32.totalorder %s146_s29, 0 }
   0xb   : > { %p775_p8 = por %p168_p5, %p167_p3  ;;  %p211_p9 = scmp.lt.s32.totalorder %s694_s23, 3 }
   0xc   : > { %s781_s6 = scalar_select %p149_p7, %s682_s20, %s151_s27  }
   0xd   : > { %p212_p10 = pnand %p536_p6, %p211_p9 }
   0xe   : > { %p244_p11 = scmp.lt.s32.totalorder (!%p212_p10), %s686_s21, 1  ;;  %v696_v0 = vmov (!%p212_p10), 0   ;;  %v265_v1 = vld [vmem:[%s866_s2] sm:$0xff] (!%p212_p10)  ;;  %v267_v2 = vld [vmem:[%s866_s2 + $0x10] sm:$0xff] (!%p212_p10)  ;;  %v266_v3 = vld [vmem:[%s866_s2 + $0x8] sm:$0xff] (!%p212_p10)  ;;  %vm306_vm0 = vcmask (!%p212_p10), 1041408  }
   0xf   : > { %215 = sbr.rel (%p212_p10) target bundleno = 499 (0x1f3), region = 40  ;;  %345 = vmatprep.mubr.bf16.mxu0 (!%p212_p10), %v696_v0  ;;  %611 = vset.pattern.permute.xlu0 (!%p212_p10), %v696_v0  ;;  %v268_v4 = vld [vmem:[%s866_s2 + $0x18] sm:$0xff] (!%p212_p10)  ;;  %v379_v8 = vld [vmem:[%s868_s4] sm:$0xff] (!%p212_p10)  ;;  %vm299_vm1 = vcmask (!%p212_p10), 31744   ;;  %v615_v12 = vld [vmem:[%s865_s1 + $0x8] sm:$0xff] (!%p212_p10)   ;;  %vm385_vm2 = vcmask (!%p212_p10), 261120  }
  0x10   : > { %612 = vset.pattern.permute.xlu1 (!%p212_p10), %v696_v0  ;;  %421 = vmatprep.mubr.bf16.mxu1 (!%p212_p10), %v696_v0  ;;  %v614_v11 = vld [vmem:[%s865_s1] sm:$0xff] (!%p212_p10)   ;;  %s240_s13 = sand.u32 (!%p212_p10), 1, %s678_s19   ;;  %s554_s15 = sshll.u32 (!%p212_p10), %s686_s21, 7 }
  0x11   : > { %271 = vperm.xlu0 (!%p212_p10), %611, %v265_v1   ;;  %281 = vperm.xlu1 (!%p212_p10), %612, %v267_v2   ;;  %v374_v45 = vld [vmem:[%s867_s3] sm:$0xf] (!%p212_p10)  ;;  %s537_s14 = sshll.u32 (!%p212_p10), %s240_s13, 3  ;;  %s817_s27 = scalar_lea.hbm (!%p212_p10), %s869_s5, %s554_s15 }
  0x12   : > { %s242_s16 = scalar_lea.vmem (!%p212_p10), [#allocation2], %s537_s14  ;;  %s440_s29 = scalar_lea.sflag (!%p212_p10), [#allocation3], %s240_s13 }
  0x15   : > { %276 = vperm.xlu0 (!%p212_p10), %611, %v266_v3   ;;  %286 = vperm.xlu1 (!%p212_p10), %612, %v268_v4  }
  0x16   : > { %s245_s7 = scalar_select %p244_p11, %s686_s21, 1 }
  0x17   : > { %s697_s21 = smov [#allocation2]  }
  0x18   : > { %s552_s12 = sshll.u32 %s245_s7, 3  ;;  %s620_s8 = sshll.u32 %s697_s21, 4  ;;  %s621_s8 = int_to_ptr.vmem [resolvable:$false] %s620_s8 }
  0x19   : > { %s251_s17 = scalar_lea.vmem %s864_s0, %s552_s12  ;;  %382 = vperm.xlu0 %611, %v379_v8   ;;  %s622_s9 = scalar_lea.vmem %s621_s8, 256 }
  0x1a   : > { %v255_v5 = vld [vmem:[%s251_s17] sm:$0xff]  ;;  %s456_s17 = sshll.u32 %s242_s16, 4  ;;  %s819_s17 = int_to_ptr.vmem [resolvable:$true] %s456_s17 }
  0x1b   : > { %v257_v6 = vcombine.high %v255_v5, %v255_v5  ;;  %v259_v7 = vpack.c.bf16 %v255_v5, %v255_v5  ;;  %s616_s7 = scalar_lea.vmem %s819_s17, 128  ;;  %p623_p1 = scmp.lt.s32.totalorder %s819_s17, %s621_s8 }
  0x1c   : > { %p617_p12 = scmp.ne.s32.totalorder %s819_s17, %s616_s7  ;;  %p624_p2 = scmp.lt.s32.totalorder %s622_s9, %s616_s7 }
  0x1d   : > { %v260_v9 = vpack.c.bf16 %v257_v6, %v257_v6  ;;  %v308_v10 = vsel %vm306_vm0, %v259_v7, 0 }
  0x1e   : > { %p618_p13 = pnand %p617_p12, %p768_p4  ;;  %p625_p3 = por %p624_p2, %p623_p1 }
  0x1f   : > { %542 = vmatprep.subr.msk.bf16.mxu0 %vm306_vm0, %v260_v9 }
  0x20   : > { %314 = vmatpush1.bf16.msra.mxu0 %v308_v10  ;;  %p619_p0 = pneg %p618_p13 }
  0x22   : > { %p626_p5 = pnand %p625_p3, %p619_p0 }
  0x23   : > { %543 = vmatmul.mubr.msk.bf16.vlgmr.msra.gmra.mrb[0].mxu0 %vm299_vm1, %v614_v11 }
  0x24   : > { %355 = vmatprep.mubr.bf16.mxu0 %v696_v0 }
  0x2b   : > { %544 = vmatmul.mubr.msk.bf16.gmra.mrb[4].mxu0 %vm299_vm1, %v615_v12 }
  0x90   : > { %v272_v13 = vpop.permute.xlu0 %271  ;;  %v282_v22 = vpop.permute.xlu1 %281 }
  0x94   : > { %v277_v17 = vpop.permute.xlu0 %276  ;;  %v287_v33 = vpop.permute.xlu1 %286 }
  0x98   : > { %v383_v46 = vpop.permute.xlu0 %382 }
  0xf6   : > { %v347_v14 = vpop.f32.mrb[0].mxu0 }
  0xf7   : > { %v348_v15 = vadd.f32 %v347_v14, %v272_v13  ;;  %v349_v16 = vpop.f32.mrb[1].mxu0 }
  0xf8   : > { %v350_v18 = vadd.f32 %v349_v16, %v272_v13  ;;  %v351_v19 = vpop.f32.mrb[2].mxu0 }
  0xf9   : > { %v352_v20 = vadd.f32 %v351_v19, %v277_v17  ;;  %v353_v21 = vpop.f32.mrb[3].mxu0  ;;  %v366_v24 = vmax.f32 %v348_v15, 0.0 }
  0xfa   : > { %v354_v23 = vadd.f32 %v353_v21, %v277_v17  ;;  %v367_v26 = vmax.f32 %v350_v18, 0.0 }
  0xfb   : > { %v368_v25 = vmax.f32 %v352_v20, 0.0 }
  0xfc   : > { %v369_v27 = vmax.f32 %v354_v23, 0.0 }
  0xfd   : > { %v375_v28 = vpack.c.bf16 %v368_v25, %v366_v24 }
  0xfe   : > { %v357_v29 = vpop.f32.mrb[4].mxu0  ;;  %v376_v30 = vpack.c.bf16 %v369_v27, %v367_v26 }
  0xff   : > { %v358_v31 = vadd.f32 %v357_v29, %v282_v22  ;;  %v359_v32 = vpop.f32.mrb[5].mxu0 }
 0x100   : > { %v360_v34 = vadd.f32 %v359_v32, %v282_v22  ;;  %v361_v35 = vpop.f32.mrb[6].mxu0  ;;  %389 = vmatprep.subr.bf16.mxu1 %v376_v30 }
 0x101   : > { %v362_v36 = vadd.f32 %v361_v35, %v287_v33  ;;  %v363_v37 = vpop.f32.mrb[7].mxu0  ;;  %390 = vmatpush1.bf16.msra.mxu1 %v375_v28  ;;  %v370_v39 = vmax.f32 %v358_v31, 0.0 }
 0x102   : > { %v364_v38 = vadd.f32 %v363_v37, %v287_v33  ;;  %v371_v41 = vmax.f32 %v360_v34, 0.0 }
 0x103   : > { %v372_v40 = vmax.f32 %v362_v36, 0.0 }
 0x104   : > { %v373_v42 = vmax.f32 %v364_v38, 0.0 }
 0x105   : > { %v377_v43 = vpack.c.bf16 %v372_v40, %v370_v39 }
 0x106   : > { %v378_v44 = vpack.c.bf16 %v373_v42, %v371_v41 }
 0x108   : > { %391 = vmatprep.subr.bf16.mxu1 %v378_v44 }
 0x109   : > { %392 = vmatpush1.bf16.msra.mxu1 %v377_v43 }
 0x10c   : > { %545 = vmatmul.mubr.msk.bf16.vlgmr.msra.gmra.mrb[0].mxu1 %vm385_vm2, %v374_v45 }
 0x1df   : > { %v423_v47 = vpop.f32.mrb[0].mxu1 }
 0x1e0   : > { %v424_v48 = vadd.f32 %v423_v47, %v383_v46  ;;  %v425_v49 = vpop.f32.mrb[1].mxu1 }
 0x1e1   : > { %v426_v50 = vadd.f32 %v425_v49, %v383_v46  ;;  %v427_v51 = vpop.f32.mrb[2].mxu1 }
 0x1e2   : > { %v428_v52 = vpop.f32.mrb[3].mxu1 }
 0x1e3   : > { %v553_v53 = vpack.c.bf16 %v426_v50, %v424_v48 }
 0x1e5   : > { %438 = vst [vmem:[%s242_s16] sm:$0xff] %v553_v53 }
 0x1e6   : > { %629 = shalt.err (!%p626_p5)
}
 0x1e7   : > { %s630_s10 = scalar_lea.hbm %s817_s27, 128  ;;  %s634_s13 = scalar_lea.hbm %s869_s5, 256 }
 0x1e8   : > { %p631_p6 = scmp.ne.s32.totalorder %s817_s27, %s630_s10  ;;  %p635_p10 = scmp.lt.u32.totalorder %s817_s27, %s869_s5 }
 0x1e9   : > { %p636_p11 = scmp.lt.u32.totalorder %s634_s13, %s630_s10  ;;  %p638_p13 = scmp.lt.u32.totalorder %s630_s10, %s817_s27 }
 0x1ea   : > { %p632_p7 = pnand %p631_p6, %p768_p4 }
 0x1eb   : > { %p637_p12 = por %p636_p11, %p635_p10 }
 0x1ec   : > { %p633_p9 = pneg %p632_p7 }
 0x1ed   : > { %p639_p0 = por %p638_p13, %p637_p12 }
 0x1ef   : > { %p640_p1 = pnand %p639_p0, %p633_p9 }
 0x1f1   : > { %643 = shalt.err (!%p640_p1)
}
 0x1f2   : > { %555 = dma.vmem_to_hbm [thread:$0]  (%p768_p4), %s819_s17, 128, %s817_s27, %s440_s29  }
 0x1f3 PF: > { %p561_p2 = scmp.ge.s32.totalorder %s694_s23, 2  ;;  %s468_s16 = sand.u32 1, %s674_s18  }
 0x1f4   : > { %s469_s24 = scalar_lea.sflag [#allocation3], %s468_s16 }
 0x1f5   : > { %p558_p3 = pnand %p561_p2, %p775_p8 }
 0x1f7   : > { %669 = dma.done.wait (!%p558_p3), %s469_s24, 128  }
 0x1f8   : > { %671 = vsyncadd (!%p558_p3), %s469_s24, 4294967168  ;;  %s18_s23 = sadd.s32 1, %s694_s23   ;;  %s872_s18 = smov %s678_s19 }
 0x1f9   : > { %p15_p5 = scmp.ge.s32.totalorder %s18_s23, 4   ;;  %s873_s19 = smov %s682_s20 }
 0x1fa   : > { %s874_s20 = smov %s781_s6  ;;  %s875_s21 = smov %s690_s22 }
 0x1fb   : > { %s876_s22 = smov %s878_s26  ;;  %17 = sbr.rel (!%p15_p5) target bundleno = 4 (0x4), region = 75 }
 0x202   :  { %474 = vsyncpa [#allocation3], 1 }
 0x203   :  { %476 = vsyncpa [#allocation3 + $0x1], 1 }

</bundles_post_ra>
